<compile_context>
chip_gen: v5e
topology: v5e:2x2
jax: 0.10.0
libtpu: 0.0.40
codegen_flags: <defaults>
</compile_context>

<pallas_src>
import functools

import jax
import jax.numpy as jnp
from jax.experimental import pallas as pl
from jax.experimental.pallas import tpu as pltpu


_SCALE = 1.0 / (64.0 ** 0.5)  # the module uses np.sqrt(64) regardless of D


def _largest_divisor_leq(n, cap):
    b = max(1, min(n, cap))
    while n % b:
        b -= 1
    return b


def _pick_q_block(S, cap=128):
    if S <= cap:
        return S
    for t in range(cap, 7, -1):          # divisor of S that is a multiple of 8
        if S % t == 0 and t % 8 == 0:
            return t
    return S


def _shrink_q_block(S, tq):
    for t in range(min(tq - 1, S), 7, -1):
        if S % t == 0 and t % 8 == 0:
            return t
    return tq


def _step_bytes(G, tq, S, D):
    # Rough per-grid-step VMEM footprint: double-buffered IO blocks plus f32
    # score-sized temporaries and bf16 operand casts inside the kernel.
    io = (G * tq * D * 4          # q block
          + 2 * G * S * D * 4     # k + v blocks
          + G * tq * S            # int8 mask block
          + G * tq * D * 4        # ctx block
          + G * tq * S * 4)       # attn block (f32)
    tmp = 4 * G * tq * S * 4 + 2 * G * S * D * 2
    return 2 * io + tmp


def _sdpa_kernel(q_ref, k_ref, v_ref, mask_ref, ctx_ref, attn_ref, *,
                 matmul_dtype):
    q = q_ref[...]                       # (G, tq, D)  f32
    k = k_ref[...]                       # (G, S,  D)  f32
    v = v_ref[...]                       # (G, S,  D)  f32
    mask = mask_ref[...]                 # (G, tq, S)  int8 (nonzero == masked)

    # Fold the (exact power-of-two) 1/sqrt(64) scale into Q, then feed the MXU
    # bf16 operands with f32 accumulation; contraction over the last dim of
    # both operands avoids any explicit K transpose.
    q_m = (q * _SCALE).astype(matmul_dtype)
    k_m = k.astype(matmul_dtype)
    scores = jnp.einsum("gqd,gkd->gqk", q_m, k_m,
                        preferred_element_type=jnp.float32)

    # masked_fill_(attn_mask, -1e9)
    scores = jnp.where(mask != 0, jnp.float32(-1e9), scores)

    # Numerically-stable softmax along keys (matches torch.nn.Softmax(dim=-1)).
    m = jnp.max(scores, axis=-1, keepdims=True)
    e = jnp.exp(scores - m)
    denom = jnp.sum(e, axis=-1, keepdims=True)
    attn = e * pl.reciprocal(denom, approx=True)

    # context = attn @ V
    ctx = jnp.einsum("gqk,gkd->gqd",
                     attn.astype(matmul_dtype), v.astype(matmul_dtype),
                     preferred_element_type=jnp.float32)

    ctx_ref[...] = ctx.astype(ctx_ref.dtype)
    attn_ref[...] = attn.astype(attn_ref.dtype)


def scaled_dot_product_attention(Q, K, V, attn_mask, *,
                                 matmul_dtype=jnp.bfloat16,
                                 vmem_budget_bytes=10 * 1024 * 1024):
    """Q, K, V: [B, H, S, D]; attn_mask: [B, H, S, S] bool (True = masked).

    Returns (context [B, H, S, D] in Q.dtype, attn [B, H, S, S] float32).
    Note: the module hardcodes the 1/sqrt(64) scale, so it is applied
    regardless of D (same as the PyTorch reference).
    """
    B, H, S, D = Q.shape
    BH = B * H

    q = Q.reshape(BH, S, D)
    k = K.reshape(BH, S, D)
    v = V.reshape(BH, S, D)
    mask = attn_mask.reshape(BH, S, S).astype(jnp.int8)

    # Tile selection: group batch-head pairs per step and block the query dim
    # so the working set fits the default scoped VMEM on all generations.
    G = _largest_divisor_leq(BH, 8)
    tq = _pick_q_block(S, 128)
    while _step_bytes(G, tq, S, D) > vmem_budget_bytes:
        if G > 1:
            G = _largest_divisor_leq(BH, G - 1)
        else:
            new_tq = _shrink_q_block(S, tq)
            if new_tq == tq:
                break
            tq = new_tq
    grid = (BH // G, S // tq)

    kernel = functools.partial(_sdpa_kernel, matmul_dtype=matmul_dtype)

    cost = pl.CostEstimate(
        flops=4 * BH * S * S * D,
        transcendentals=BH * S * S,
        bytes_accessed=(3 * BH * S * D * Q.dtype.itemsize   # Q, K, V
                        + BH * S * S                        # int8 mask
                        + BH * S * D * Q.dtype.itemsize     # ctx
                        + BH * S * S * 4),                  # attn (f32)
    )

    ctx, attn = pl.pallas_call(
        kernel,
        out_shape=(
            jax.ShapeDtypeStruct((BH, S, D), Q.dtype),
            jax.ShapeDtypeStruct((BH, S, S), jnp.float32),
        ),
        grid_spec=pltpu.PrefetchScalarGridSpec(
            num_scalar_prefetch=0,
            grid=grid,
            in_specs=[
                pl.BlockSpec((G, tq, D), lambda g, qi: (g, qi, 0)),
                # K/V blocks depend only on g: with the query axis innermost
                # they stay resident in VMEM across all query tiles of a group.
                pl.BlockSpec((G, S, D), lambda g, qi: (g, 0, 0)),
                pl.BlockSpec((G, S, D), lambda g, qi: (g, 0, 0)),
                pl.BlockSpec((G, tq, S), lambda g, qi: (g, qi, 0)),
            ],
            out_specs=[
                pl.BlockSpec((G, tq, D), lambda g, qi: (g, qi, 0)),
                pl.BlockSpec((G, tq, S), lambda g, qi: (g, qi, 0)),
            ],
        ),
        compiler_params=pltpu.CompilerParams(
            dimension_semantics=("parallel", "parallel"),
        ),
        cost_estimate=cost,
    )(q, k, v, mask)

    return ctx.reshape(B, H, S, D), attn.reshape(B, H, S, S)


if __name__ == "__main__":
    key = jax.random.PRNGKey(0)
    kq, kk, kv = jax.random.split(key, 3)

    B, H, S, D = 2, 2, 8, 64   # the module hardcodes sqrt(64), so D = 64

    Q = jax.random.normal(kq, (B, H, S, D), dtype=jnp.float32)
    K = jax.random.normal(kk, (B, H, S, D), dtype=jnp.float32)
    V = jax.random.normal(kv, (B, H, S, D), dtype=jnp.float32)

    # BERT-style key-padding mask: last 2 key positions masked for every query.
    key_pad = jnp.zeros((B, S), dtype=bool).at[:, -2:].set(True)
    attn_mask = jnp.broadcast_to(key_pad[:, None, None, :], (B, H, S, S))

    ctx, attn = scaled_dot_product_attention(Q, K, V, attn_mask)
    jax.block_until_ready((ctx, attn))

    # Plain-JAX f32 reference.  The kernel uses bf16 MXU operands with f32
    # accumulation, so allow a ~1e-2-level tolerance.
    scores_ref = jnp.einsum("bhqd,bhkd->bhqk", Q, K) / jnp.sqrt(64.0)
    scores_ref = jnp.where(attn_mask, -1e9, scores_ref)
    attn_ref = jax.nn.softmax(scores_ref, axis=-1)
    ctx_ref = jnp.einsum("bhqk,bhkd->bhqd", attn_ref, V)
    assert jnp.allclose(attn, attn_ref, atol=5e-2, rtol=5e-2)
    assert jnp.allclose(ctx, ctx_ref, atol=5e-2, rtol=5e-2)

    print("KERNEL_OK")
</pallas_src>

<mosaic_0001>
module attributes {stable_mosaic.version = 11 : i64} {
  func.func @_sdpa_kernel(%arg0: i32, %arg1: i32, %arg2: memref<4x8x64xf32, #tpu.memory_space<vmem>>, %arg3: memref<4x8x64xf32, #tpu.memory_space<vmem>>, %arg4: memref<4x8x64xf32, #tpu.memory_space<vmem>>, %arg5: memref<4x8x8xi8, #tpu.memory_space<vmem>>, %arg6: memref<4x8x64xf32, #tpu.memory_space<vmem>>, %arg7: memref<4x8x8xf32, #tpu.memory_space<vmem>>) attributes {dimension_semantics = [#tpu.dimension_semantics<parallel>, #tpu.dimension_semantics<parallel>], iteration_bounds = array<i64: 1, 1>, scalar_prefetch = 0 : i64, scratch_operands = 0 : i64, tpu.core_type = #tpu.core_type<tc>, window_params = [{transform_indices = @transform_0, window_bounds = array<i64: 4, 8, 64>}, {transform_indices = @transform_1, window_bounds = array<i64: 4, 8, 64>}, {transform_indices = @transform_2, window_bounds = array<i64: 4, 8, 64>}, {transform_indices = @transform_3, window_bounds = array<i64: 4, 8, 8>}, {transform_indices = @transform_4, window_bounds = array<i64: 4, 8, 64>}, {transform_indices = @transform_5, window_bounds = array<i64: 4, 8, 8>}]} {
    %c0 = arith.constant 0 : index
    %c0_0 = arith.constant 0 : index
    %c0_1 = arith.constant 0 : index
    %0 = vector.load %arg2[%c0, %c0_0, %c0_1] : memref<4x8x64xf32, #tpu.memory_space<vmem>>, vector<4x8x64xf32>
    %c0_2 = arith.constant 0 : index
    %c0_3 = arith.constant 0 : index
    %c0_4 = arith.constant 0 : index
    %1 = vector.load %arg3[%c0_2, %c0_3, %c0_4] : memref<4x8x64xf32, #tpu.memory_space<vmem>>, vector<4x8x64xf32>
    %c0_5 = arith.constant 0 : index
    %c0_6 = arith.constant 0 : index
    %c0_7 = arith.constant 0 : index
    %2 = vector.load %arg4[%c0_5, %c0_6, %c0_7] : memref<4x8x64xf32, #tpu.memory_space<vmem>>, vector<4x8x64xf32>
    %c0_8 = arith.constant 0 : index
    %c0_9 = arith.constant 0 : index
    %c0_10 = arith.constant 0 : index
    %3 = vector.load %arg5[%c0_8, %c0_9, %c0_10] : memref<4x8x8xi8, #tpu.memory_space<vmem>>, vector<4x8x8xi8>
    %cst = arith.constant 1.250000e-01 : f32
    %4 = vector.broadcast %cst : f32 to vector<4x8x64xf32>
    %5 = arith.mulf %0, %4 : vector<4x8x64xf32>
    %6 = arith.truncf %5 : vector<4x8x64xf32> to vector<4x8x64xbf16>
    %7 = arith.truncf %1 : vector<4x8x64xf32> to vector<4x8x64xbf16>
    "tpu.trace_start"() <{level = 10 : i32, message = "gqd,gkd->gqk"}> : () -> ()
    %cst_11 = arith.constant dense<0.000000e+00> : vector<4x8x8xf32>
    %8 = tpu.matmul %6, %7, %cst_11 {dimension_numbers = #tpu.dot_dimension_numbers<[2], [2], [1], [1], [0, 0, 0, 1, 1, 1], [0], [0]>} : vector<4x8x64xbf16>, vector<4x8x64xbf16>, vector<4x8x8xf32> -> vector<4x8x8xf32>
    %c0_i8 = arith.constant 0 : i8
    "tpu.trace_stop"() : () -> ()
    %9 = vector.broadcast %c0_i8 : i8 to vector<4x8x8xi8>
    %10 = arith.cmpi ne, %3, %9 : vector<4x8x8xi8>
    %cst_12 = arith.constant -1.000000e+09 : f32
    %11 = vector.broadcast %cst_12 : f32 to vector<4x8x8xf32>
    %12 = arith.select %10, %11, %8 : vector<4x8x8xi1>, vector<4x8x8xf32>
    %cst_13 = arith.constant dense<0xFF800000> : vector<4x8xf32>
    %13 = vector.multi_reduction <maximumf>, %12, %cst_13 [2] : vector<4x8x8xf32> to vector<4x8xf32>
    %14 = vector.shape_cast %13 : vector<4x8xf32> to vector<4x8x1xf32>
    %15 = vector.broadcast %14 : vector<4x8x1xf32> to vector<4x8x8xf32>
    %16 = arith.subf %12, %15 : vector<4x8x8xf32>
    %17 = math.exp %16 : vector<4x8x8xf32>
    %cst_14 = arith.constant dense<0.000000e+00> : vector<4x8xf32>
    %18 = vector.multi_reduction <add>, %17, %cst_14 [2] : vector<4x8x8xf32> to vector<4x8xf32>
    %19 = vector.shape_cast %18 : vector<4x8xf32> to vector<4x8x1xf32>
    %20 = tpu.reciprocal %19 {approx = true} : vector<4x8x1xf32> -> vector<4x8x1xf32>
    %21 = vector.broadcast %20 : vector<4x8x1xf32> to vector<4x8x8xf32>
    %22 = arith.mulf %17, %21 : vector<4x8x8xf32>
    %23 = arith.truncf %22 : vector<4x8x8xf32> to vector<4x8x8xbf16>
    %24 = arith.truncf %2 : vector<4x8x64xf32> to vector<4x8x64xbf16>
    "tpu.trace_start"() <{level = 10 : i32, message = "gqk,gkd->gqd"}> : () -> ()
    %cst_15 = arith.constant dense<0.000000e+00> : vector<4x8x64xf32>
    %25 = tpu.matmul %23, %24, %cst_15 {dimension_numbers = #tpu.dot_dimension_numbers<[2], [1], [1], [2], [0, 0, 0, 1, 1, 2], [0], [0]>} : vector<4x8x8xbf16>, vector<4x8x64xbf16>, vector<4x8x64xf32> -> vector<4x8x64xf32>
    "tpu.trace_stop"() : () -> ()
    %c0_16 = arith.constant 0 : index
    %c0_17 = arith.constant 0 : index
    %c0_18 = arith.constant 0 : index
    %26 = vector.load %arg6[%c0_16, %c0_17, %c0_18] : memref<4x8x64xf32, #tpu.memory_space<vmem>>, vector<4x8x64xf32>
    tpu.vector_store %arg6[%c0_16, %c0_17, %c0_18], %25 {strides = array<i32>} : memref<4x8x64xf32, #tpu.memory_space<vmem>>, vector<4x8x64xf32>,
    %c0_19 = arith.constant 0 : index
    %c0_20 = arith.constant 0 : index
    %c0_21 = arith.constant 0 : index
    %27 = vector.load %arg7[%c0_19, %c0_20, %c0_21] : memref<4x8x8xf32, #tpu.memory_space<vmem>>, vector<4x8x8xf32>
    tpu.vector_store %arg7[%c0_19, %c0_20, %c0_21], %22 {strides = array<i32>} : memref<4x8x8xf32, #tpu.memory_space<vmem>>, vector<4x8x8xf32>,
    return
  }
  func.func @transform_0(%arg0: i32, %arg1: i32) -> (i32, i32, i32) {
    %c0_i32 = arith.constant 0 : i32
    %c0_i32_0 = arith.constant 0 : i32
    return %arg0, %arg1, %c0_i32 : i32, i32, i32
  }
  func.func @transform_1(%arg0: i32, %arg1: i32) -> (i32, i32, i32) {
    %c0_i32 = arith.constant 0 : i32
    %c0_i32_0 = arith.constant 0 : i32
    %c0_i32_1 = arith.constant 0 : i32
    return %arg0, %c0_i32, %c0_i32_0 : i32, i32, i32
  }
  func.func @transform_2(%arg0: i32, %arg1: i32) -> (i32, i32, i32) {
    %c0_i32 = arith.constant 0 : i32
    %c0_i32_0 = arith.constant 0 : i32
    %c0_i32_1 = arith.constant 0 : i32
    return %arg0, %c0_i32, %c0_i32_0 : i32, i32, i32
  }
  func.func @transform_3(%arg0: i32, %arg1: i32) -> (i32, i32, i32) {
    %c0_i32 = arith.constant 0 : i32
    %c0_i32_0 = arith.constant 0 : i32
    return %arg0, %arg1, %c0_i32 : i32, i32, i32
  }
  func.func @transform_4(%arg0: i32, %arg1: i32) -> (i32, i32, i32) {
    %c0_i32 = arith.constant 0 : i32
    %c0_i32_0 = arith.constant 0 : i32
    return %arg0, %arg1, %c0_i32 : i32, i32, i32
  }
  func.func @transform_5(%arg0: i32, %arg1: i32) -> (i32, i32, i32) {
    %c0_i32 = arith.constant 0 : i32
    %c0_i32_0 = arith.constant 0 : i32
    return %arg0, %arg1, %c0_i32 : i32, i32, i32
  }
}

</mosaic_0001>

<bundles_post_ra>
// kernel: tpu_custom_call.1
= control target key start
LH: loop header
LB: loop body
LE: loop exit
PB: predicated region body
PF: predicated region fallthrough
CT: control target
= control target key end

     0   :  { %11 = vsyncpa [#allocation3], 0  ;;  %s680_s0 = inlined_call_operand.hbm [shape: f32[4,8,64], index: 0, kind: input, shape index: {}]   ;;  %s681_s1 = inlined_call_operand.hbm [shape: f32[4,8,64], index: 1, kind: input, shape index: {}]   ;;  %s682_s2 = inlined_call_operand.hbm [shape: f32[4,8,64], index: 2, kind: input, shape index: {}]   ;;  %s683_s3 = inlined_call_operand.hbm [shape: s8[4,8,8], index: 3, kind: input, shape index: {}]   ;;  %s684_s4 = inlined_call_operand.hbm [shape: f32[4,8,64], index: 4, kind: output, shape index: {0}]   ;;  %s685_s5 = inlined_call_operand.hbm [shape: f32[4,8,8], index: 5, kind: output, shape index: {1}]  }
   0x1   :  { %12 = vsyncpa [#allocation6], 0 }
   0x2   :  { %13 = vsyncpa [#allocation9], 0 }
   0x3   :  { %14 = vsyncpa [#allocation4], 0 }
   0x4   :  { %15 = vsyncpa [#allocation12], 0  ;;  %s33_s20 = sshll.u32 %s681_s1, 4  ;;  %s578_s21 = smov [#allocation5]   ;;  %s34_s20 = int_to_ptr.hbm [resolvable:$true] %s33_s20 }
   0x5   :  { %s35_s22 = sshll.u32 %s578_s21, 4  ;;  %s20_s25 = sshll.u32 %s680_s0, 4  ;;  %s36_s22 = int_to_ptr.vmem [resolvable:$true] %s35_s22  ;;  %s21_s25 = int_to_ptr.hbm [resolvable:$true] %s20_s25 }
   0x6   :  { %s579_s26 = smov 128   ;;  %s580_s27 = smov 8  }
   0x7   :  { %41 = dma.hbm_to_vmem [thread:$0]  %s34_s20, 512, %s36_s22, [#allocation6], %s579_s26, %s579_s26, %s580_s27  }
   0x8   :  { %s581_s28 = smov [#allocation2]   ;;  %s46_s1 = sshll.u32 %s682_s2, 4  ;;  %s47_s1 = int_to_ptr.hbm [resolvable:$true] %s46_s1 }
   0x9   :  { %s22_s29 = sshll.u32 %s581_s28, 4  ;;  %s59_s8 = sshll.u32 %s683_s3, 4  ;;  %s23_s29 = int_to_ptr.vmem [resolvable:$true] %s22_s29  ;;  %s60_s8 = int_to_ptr.hbm [resolvable:$true] %s59_s8 }
   0xa   :  { %28 = dma.hbm_to_vmem [thread:$0]  %s21_s25, 512, %s23_s29, [#allocation3], %s579_s26, %s579_s26, %s580_s27  }
   0xb   :  { %s582_s9 = smov [#allocation7]   ;;  %s583_s11 = smov [#allocation8]  }
   0xc   :  { %s48_s10 = sshll.u32 %s582_s9, 4  ;;  %s61_s2 = sshll.u32 %s583_s11, 4  ;;  %s49_s10 = int_to_ptr.vmem [resolvable:$true] %s48_s10  ;;  %s62_s2 = int_to_ptr.vmem [resolvable:$true] %s61_s2 }
   0xd   :  { %54 = dma.hbm_to_vmem [thread:$0]  %s47_s1, 512, %s49_s10, [#allocation6], %s579_s26, %s579_s26, %s580_s27  }
   0xe   :  { %s584_s12 = smov 32   ;;  %s585_s13 = smov 2  }
   0xf   :  { %67 = dma.hbm_to_vmem [thread:$0]  %s60_s8, 128, %s62_s2, [#allocation9], %s584_s12, %s584_s12, %s585_s13  }
  0x10   :  { %568 = dma.done.wait [#allocation3], 512  }
  0x11   :  { %569 = vsyncadd [#allocation3], 4294966784 }
  0x12   :  { %570 = dma.done.wait [#allocation6], 1024  }
  0x13   :  { %571 = vsyncadd [#allocation6], 4294966272 }
  0x14   :  { %572 = dma.done.wait [#allocation9], 128  }
  0x15   :  { %573 = vsyncadd [#allocation9], 4294967168  ;;  %v91_v0 = vld [vmem:[#allocation5] sm:$0xff]  ;;  %vm115_vm0 = vcmask 523264   ;;  %v93_v1 = vld [vmem:[#allocation5 + $0x10] sm:$0xff]  ;;  %v586_v26 = vmov 0  }
  0x16   :  { %v94_v2 = vld [vmem:[#allocation5 + $0x18] sm:$0xff]  ;;  %v111_v3 = vpack.c.bf16 %v91_v0, %v91_v0  ;;  %v113_v4 = vpack.c.bf16 %v93_v1, %v93_v1  ;;  %v87_v6 = vld [vmem:[#allocation2] sm:$0xff]  ;;  %v89_v7 = vld [vmem:[#allocation2 + $0x10] sm:$0xff]  ;;  %vm212_vm6 = vcmask 64512   ;;  %vm268_vm10 = vcmask 1043456   ;;  %s587_s3 = smov [#allocation11]  }
  0x17   :  { %v114_v5 = vpack.c.bf16 %v94_v2, %v94_v2  ;;  %v90_v8 = vld [vmem:[#allocation2 + $0x18] sm:$0xff]  ;;  %v103_v9 = vmul.f32 0.125, %v87_v6  ;;  %v105_v10 = vmul.f32 0.125, %v89_v7  ;;  %v92_v11 = vld [vmem:[#allocation5 + $0x8] sm:$0xff]  ;;  %v99_v24 = vld [vmem:[#allocation8] sm:$0x3] }
  0x18   :  { %v88_v12 = vld [vmem:[#allocation2 + $0x8] sm:$0xff]  ;;  %v120_v13 = vsel %vm115_vm0, %v111_v3, 0  ;;  %v158_v14 = vsel %vm115_vm0, %v113_v4, 0  ;;  %v112_v16 = vpack.c.bf16 %v92_v11, %v92_v11  ;;  %v106_v17 = vmul.f32 0.125, %v90_v8  ;;  %v100_v25 = vld [vmem:[#allocation8 + $0x2] sm:$0x3] }
  0x19   :  { %v177_v15 = vsel %vm115_vm0, %v114_v5, 0  ;;  %129 = vmatpush.bf16.xpose.msra.mxu0 %v120_v13  ;;  %167 = vmatpush.bf16.xpose.msra.mxu2 %v158_v14  ;;  %v104_v19 = vmul.f32 0.125, %v88_v12  ;;  %v107_v20 = vpack.c.bf16 %v103_v9, %v103_v9  ;;  %v109_v21 = vpack.c.bf16 %v105_v10, %v105_v10  ;;  %v101_v28 = vld [vmem:[#allocation8 + $0x4] sm:$0x3]  ;;  %v102_v30 = vld [vmem:[#allocation8 + $0x6] sm:$0x3] }
  0x1a   :  { %186 = vmatpush.bf16.xpose.msra.mxu3 %v177_v15  ;;  %v139_v18 = vsel %vm115_vm0, %v112_v16, 0  ;;  %v110_v22 = vpack.c.bf16 %v106_v17, %v106_v17  ;;  %vm192_vm1 = vnez %v99_v24  ;;  %vm193_vm2 = vnez %v100_v25  ;;  %v95_v9 = vld [vmem:[#allocation7] sm:$0xff]  ;;  %v97_v12 = vld [vmem:[#allocation7 + $0x10] sm:$0xff]  ;;  %v96_v14 = vld [vmem:[#allocation7 + $0x8] sm:$0xff]  ;;  %s367_s14 = sshll.u32 %s587_s3, 4  ;;  %s369_s17 = sshll.u32 %s685_s5, 4  ;;  %s368_s14 = int_to_ptr.vmem [resolvable:$true] %s367_s14  ;;  %s370_s17 = int_to_ptr.hbm [resolvable:$true] %s369_s17 }
  0x1b   :  { %148 = vmatpush.bf16.xpose.msra.mxu1 %v139_v18  ;;  %v108_v23 = vpack.c.bf16 %v104_v19, %v104_v19  ;;  %v196_v27 = vsel %vm192_vm1, 16843009, %v586_v26  ;;  %vm194_vm3 = vnez %v101_v28  ;;  %v197_v31 = vsel %vm193_vm2, 16843009, %v586_v26  ;;  %v98_v18 = vld [vmem:[#allocation7 + $0x18] sm:$0xff]  ;;  %s588_s18 = smov [#allocation10]  }
  0x1c   :  { %v200_v29 = vunpack.c.0.s8 %v196_v27  ;;  %v198_v32 = vsel %vm194_vm3, 16843009, %v586_v26  ;;  %vm195_vm5 = vnez %v102_v30  ;;  %v201_v33 = vunpack.c.0.s8 %v197_v31  ;;  %s354_s19 = sshll.u32 %s588_s18, 4  ;;  %s356_s21 = sshll.u32 %s684_s4, 4  ;;  %s355_s19 = int_to_ptr.vmem [resolvable:$true] %s354_s19  ;;  %s357_s21 = int_to_ptr.hbm [resolvable:$true] %s356_s21 }
  0x1d   :  { %v202_v35 = vunpack.c.0.s8 %v198_v32  ;;  %v199_v37 = vsel %vm195_vm5, 16843009, %v586_v26  ;;  %v261_v10 = vpack.c.bf16 %v95_v9, %v95_v9  ;;  %v263_v13 = vpack.c.bf16 %v97_v12, %v97_v12 }
  0x1e   :  { %vm204_vm4 = vcmp.ne.s32.totalorder %v200_v29, 0  ;;  %vm205_vm7 = vcmp.ne.s32.totalorder %v201_v33, 0  ;;  %v203_v40 = vunpack.c.0.s8 %v199_v37  ;;  %v262_v16 = vpack.c.bf16 %v96_v14, %v96_v14 }
  0x1f   :  { %vm206_vm8 = vcmp.ne.s32.totalorder %v202_v35, 0  ;;  %v270_v11 = vsel %vm268_vm10, %v261_v10, 0  ;;  %v308_v15 = vsel %vm268_vm10, %v263_v13, 0  ;;  %v264_v19 = vpack.c.bf16 %v98_v18, %v98_v18 }
  0x20   :  { %389 = vmatmul.msk.bf16.vlgmr.msra.gmra.mxu0 %vm115_vm0, %v107_v20  ;;  %391 = vmatmul.msk.bf16.vlgmr.msra.gmra.mxu2 %vm115_vm0, %v109_v21  ;;  %vm207_vm9 = vcmp.ne.s32.totalorder %v203_v40, 0  ;;  %v289_v17 = vsel %vm268_vm10, %v262_v16, 0 }
  0x21   :  { %392 = vmatmul.msk.bf16.vlgmr.msra.gmra.mxu3 %vm115_vm0, %v110_v22  ;;  %279 = vmatpush.bf16.msrb.mxu0 %v270_v11  ;;  %v327_v20 = vsel %vm268_vm10, %v264_v19, 0 }
  0x22   :  { %390 = vmatmul.msk.bf16.vlgmr.msra.gmra.mxu1 %vm115_vm0, %v108_v23  ;;  %317 = vmatpush.bf16.msrb.mxu2 %v308_v15 }
  0x23   :  { %298 = vmatpush.bf16.msrb.mxu1 %v289_v17  ;;  %336 = vmatpush.bf16.msrb.mxu3 %v327_v20 }
  0x9d   :  { %v131_v34 = vpop.f32.mrf.mxu0 }
  0x9e   :  { %v208_v36 = vsel %vm204_vm4, -1e+09, %v131_v34 }
  0x9f   :  { %v213_v38 = vsel %vm212_vm6, %v208_v36, -inf  ;;  %v150_v39 = vpop.f32.mrf.mxu1 }
  0xa0   :  { %214 = vmax.xlane.f32.xlu1 %v213_v38  ;;  %v209_v41 = vsel %vm205_vm7, -1e+09, %v150_v39 }
  0xa1   :  { %v216_v46 = vsel %vm212_vm6, %v209_v41, -inf }
  0xa3   :  { %v169_v42 = vpop.f32.mrf.mxu2 }
  0xa4   :  { %v210_v43 = vsel %vm206_vm8, -1e+09, %v169_v42  ;;  %v188_v44 = vpop.f32.mrf.mxu3 }
  0xa5   :  { %v219_v45 = vsel %vm212_vm6, %v210_v43, -inf  ;;  %v133_v47 = vpop.f32.mrf.mxu0  ;;  %v211_v49 = vsel %vm207_vm9, -1e+09, %v188_v44 }
  0xa6   :  { %220 = vmax.xlane.f32.xlu0 %v219_v45  ;;  %v222_v51 = vsel %vm212_vm6, %v211_v49, -inf }
  0xa7   :  { %v152_v48 = vpop.f32.mrf.mxu1 }
  0xa8   :  { %217 = vmax.xlane.f32.xlu1 %v216_v46 }
  0xab   :  { %v171_v50 = vpop.f32.mrf.mxu2 }
  0xac   :  { %v190_v52 = vpop.f32.mrf.mxu3 }
  0xae   :  { %223 = vmax.xlane.f32.xlu0 %v222_v51 }
 0x113   :  { %v215_v53 = vpop.xlane.xlu1 %214 }
 0x114   :  { %v225_v54 = vsub.f32 %v208_v36, %v215_v53 }
 0x116   :  { %v229_v55 = vmul.f32 1.442695, %v225_v54 }
 0x118   :  { %408 = vpow2.f32 %v229_v55 }
 0x119   :  { %v221_v56 = vpop.xlane.xlu0 %220 }
 0x11a   :  { %v227_v57 = vsub.f32 %v210_v43, %v221_v56 }
 0x11b   :  { %v218_v58 = vpop.xlane.xlu1 %217 }
 0x11c   :  { %v233_v59 = vmul.f32 1.442695, %v227_v57  ;;  %v226_v60 = vsub.f32 %v209_v41, %v218_v58 }
 0x11e   :  { %v409_v61 = vpop.eup %408  ;;  %410 = vpow2.f32 %v233_v59  ;;  %v231_v62 = vmul.f32 1.442695, %v226_v60 }
 0x11f   :  { %v237_v63 = vsel %vm212_vm6, %v409_v61, 0.0 }
 0x120   :  { %412 = vpow2.f32 %v231_v62  ;;  %238 = vadd.xlane.f32.xlu0 %v237_v63 }
 0x121   :  { %v224_v0 = vpop.xlane.xlu0 %223 }
 0x122   :  { %v228_v1 = vsub.f32 %v211_v49, %v224_v0 }
 0x124   :  { %v411_v2 = vpop.eup %410  ;;  %v235_v3 = vmul.f32 1.442695, %v228_v1 }
 0x125   :  { %v243_v4 = vsel %vm212_vm6, %v411_v2, 0.0 }
 0x126   :  { %v413_v5 = vpop.eup %412  ;;  %414 = vpow2.f32 %v235_v3  ;;  %244 = vadd.xlane.f32.xlu2 %v243_v4 }
 0x127   :  { %v240_v6 = vsel %vm212_vm6, %v413_v5, 0.0 }
 0x128   :  { %241 = vadd.xlane.f32.xlu1 %v240_v6 }
 0x12c   :  { %v415_v7 = vpop.eup %414 }
 0x12d   :  { %v246_v8 = vsel %vm212_vm6, %v415_v7, 0.0 }
 0x12e   :  { %247 = vadd.xlane.f32.xlu2 %v246_v8 }
 0x193   :  { %v239_v21 = vpop.xlane.xlu0 %238 }
 0x194   :  { %416 = vrcp.f32 %v239_v21 }
 0x199   :  { %v245_v22 = vpop.xlane.xlu2 %244 }
 0x19a   :  { %v417_v23 = vpop.eup %416  ;;  %418 = vrcp.f32 %v245_v22 }
 0x19b   :  { %v253_v24 = vmul.f32 %v417_v23, %v409_v61  ;;  %v242_v25 = vpop.xlane.xlu1 %241 }
 0x19c   :  { %420 = vrcp.f32 %v242_v25 }
 0x19d   :  { %346 = vst.msk [vmem:[#allocation11] sm:$0xff] %vm212_vm6, %v253_v24  ;;  %v257_v26 = vpack.c.bf16 %v253_v24, %v253_v24 }
 0x19f   :  { %393 = vmatmul.msk.bf16.vlgmr.msrb.gmra.mxu0 %vm212_vm6, %v257_v26 }
 0x1a0   :  { %v419_v27 = vpop.eup %418 }
 0x1a1   :  { %v255_v28 = vmul.f32 %v419_v27, %v411_v2  ;;  %v248_v29 = vpop.xlane.xlu2 %247 }
 0x1a2   :  { %v421_v30 = vpop.eup %420  ;;  %422 = vrcp.f32 %v248_v29 }
 0x1a3   :  { %348 = vst.msk [vmem:[#allocation11 + $0x10] sm:$0xff] %vm212_vm6, %v255_v28  ;;  %v254_v31 = vmul.f32 %v421_v30, %v413_v5  ;;  %v259_v32 = vpack.c.bf16 %v255_v28, %v255_v28 }
 0x1a5   :  { %347 = vst.msk [vmem:[#allocation11 + $0x8] sm:$0xff] %vm212_vm6, %v254_v31  ;;  %395 = vmatmul.msk.bf16.vlgmr.msrb.gmra.mxu2 %vm212_vm6, %v259_v32  ;;  %v258_v33 = vpack.c.bf16 %v254_v31, %v254_v31 }
 0x1a7   :  { %394 = vmatmul.msk.bf16.vlgmr.msrb.gmra.mxu1 %vm212_vm6, %v258_v33 }
 0x1a8   :  { %v423_v34 = vpop.eup %422 }
 0x1a9   :  { %v256_v35 = vmul.f32 %v423_v34, %v415_v7 }
 0x1ab   :  { %349 = vst.msk [vmem:[#allocation11 + $0x18] sm:$0xff] %vm212_vm6, %v256_v35  ;;  %v260_v36 = vpack.c.bf16 %v256_v35, %v256_v35 }
 0x1ac   :  { %375 = dma.vmem_to_hbm [thread:$0]  %s368_s14, 512, %s370_s17, [#allocation12], %s579_s26, %s579_s26, %s580_s27  }
 0x1ad   :  { %396 = vmatmul.msk.bf16.vlgmr.msrb.gmra.mxu3 %vm212_vm6, %v260_v36 }
 0x21c   :  { %v281_v37 = vpop.f32.mrf.mxu0 }
 0x21d   :  { %342 = vst.msk [vmem:[#allocation10] sm:$0xff] %vm115_vm0, %v281_v37 }
 0x224   :  { %v283_v38 = vpop.f32.mrf.mxu0  ;;  %v300_v39 = vpop.f32.mrf.mxu1 }
 0x225   :  { %343 = vst.msk [vmem:[#allocation10 + $0x8] sm:$0xff] %vm115_vm0, %v300_v39 }
 0x228   :  { %v319_v40 = vpop.f32.mrf.mxu2 }
 0x229   :  { %344 = vst.msk [vmem:[#allocation10 + $0x10] sm:$0xff] %vm115_vm0, %v319_v40 }
 0x22c   :  { %v302_v41 = vpop.f32.mrf.mxu1 }
 0x230   :  { %v321_v42 = vpop.f32.mrf.mxu2  ;;  %v338_v43 = vpop.f32.mrf.mxu3 }
 0x231   :  { %345 = vst.msk [vmem:[#allocation10 + $0x18] sm:$0xff] %vm115_vm0, %v338_v43 }
 0x232   :  { %362 = dma.vmem_to_hbm [thread:$0]  %s355_s19, 512, %s357_s21, [#allocation4], %s579_s26, %s579_s26, %s580_s27  }
 0x238   :  { %v340_v44 = vpop.f32.mrf.mxu3 }
 0x239   :  { %574 = dma.done.wait [#allocation4], 512  }
 0x23a   :  { %575 = vsyncadd [#allocation4], 4294966784 }
 0x23b   :  { %576 = dma.done.wait [#allocation12], 512  }
 0x23c   :  { %577 = vsyncadd [#allocation12], 4294966784 }
 0x23d   :  { %384 = vsyncpa [#allocation3], 1 }
 0x23e   :  { %385 = vsyncpa [#allocation6], 1 }
 0x23f   :  { %386 = vsyncpa [#allocation9], 1 }
 0x240   :  { %387 = vsyncpa [#allocation4], 1 }
 0x241   :  { %388 = vsyncpa [#allocation12], 1 }

</bundles_post_ra>
